<compile_context>
chip_gen: v6e
topology: v6e:2x2x1
jax: 0.10.0
libtpu: 0.0.40
codegen_flags: <defaults>
</compile_context>

<pallas_src>
import numpy as np
import jax
import jax.numpy as jnp
from jax.experimental import pallas as pl
from jax.experimental.pallas import tpu as pltpu


TEMPERATURE = 1.0
INV_TEMPERATURE = 1.0 / TEMPERATURE
_SMALL_BYTES = 1 << 20          # below this, XLA fusion beats a pallas_call launch


def _round_up(x, m):
    return ((x + m - 1) // m) * m


def _spatial_softmax_kernel(feat_ref, pos_ref, out_ref):
    # feat_ref : (T, HW)   row tile of flattened feature maps, native dtype
    # pos_ref  : (2, HW)   f32, rows [pos_x, pos_y]
    # out_ref  : (T, 2)    [expected_x, expected_y] per row
    f = feat_ref[...].astype(jnp.float32)
    if INV_TEMPERATURE != 1.0:              # folded at trace time (elided for T=1.0)
        f = f * INV_TEMPERATURE

    # Numerically stable softmax weights along the lane (HW) axis.
    m = jnp.max(f, axis=-1, keepdims=True)
    e = jnp.exp(f - m)                      # EUP

    pos = pos_ref[...]
    px = pos[0:1, :]                        # (1, HW) broadcast rows
    py = pos[1:2, :]

    # VPU multiplies + lane (XLU) reductions — no MXU, full f32 accuracy.
    den = jnp.sum(e, axis=-1, keepdims=True)
    nx = jnp.sum(e * px, axis=-1, keepdims=True)
    ny = jnp.sum(e * py, axis=-1, keepdims=True)

    inv = pl.reciprocal(den, approx=True)   # EUP seed on a (T, 1) column only
    inv = inv * (2.0 - den * inv)           # one Newton step -> ~f32 accuracy
    out = jnp.concatenate([nx * inv, ny * inv], axis=-1)
    out_ref[...] = out.astype(out_ref.dtype)


def make_position_rows(height, width):
    """(2, H*W) f32: row0 = pos_x, row1 = pos_y.

    Mirrors the PyTorch __init__ meshgrid exactly (default 'xy' indexing gives
    (W, H)-shaped grids flattened row-major) — faithful to the reference even
    though it effectively swaps x/y semantics when H != W.
    """
    pos_x_np, pos_y_np = np.meshgrid(
        np.linspace(-1.0, 1.0, height), np.linspace(-1.0, 1.0, width)
    )
    hw = height * width
    rows = np.stack([pos_x_np.reshape(hw), pos_y_np.reshape(hw)]).astype(np.float32)
    return jnp.asarray(rows)


def _tpu_hw_params():
    """Best-effort (VMEM bytes per core, TensorCores per device); safe defaults."""
    vmem = 64 * 1024 * 1024          # conservative: v7x per-TC VMEM
    cores = 1
    try:
        info = pltpu.get_tpu_info()
        v = getattr(info, "vmem_capacity_bytes", None)
        if v:
            vmem = int(v)
        for name in ("num_cores", "cores_per_chip", "tensorcores_per_chip"):
            c = getattr(info, name, None)
            if c:
                cores = int(c)
                break
    except Exception:
        pass
    if cores == 1:
        try:
            cores = int(getattr(jax.devices()[0], "num_cores", 1) or 1)
        except Exception:
            pass
    return vmem, max(1, cores)


def _choose_row_tile(rows, hw, itemsize, vmem_cap, num_cores):
    """Largest sublane-aligned row tile whose double-buffered native-dtype stream
    plus in-kernel f32 temporaries fit a conservative VMEM budget.  On megacore
    parts (v7x) also leave >= 2 grid steps per TensorCore when that still allows
    a reasonably large tile; on single-TC chips (v5e/v6e) never shrink the tile
    just to create extra grid steps."""
    hw_lanes = _round_up(hw, 128)                                   # physical lane footprint
    bytes_per_row = 2 * hw_lanes * itemsize + 2 * hw_lanes * 4      # 2x stream + f32 f/e temps
    budget = max(4 << 20, min(vmem_cap // 2, 32 << 20))
    cap = max(8, min(1024, (budget // bytes_per_row) // 8 * 8))
    tile = min(cap, _round_up(rows, 8))
    if num_cores > 1:
        split = _round_up(pl.cdiv(rows, 2 * num_cores), 8)          # 2 steps per core
        if split >= 256:
            tile = min(tile, split)
        else:
            half = _round_up(pl.cdiv(rows, num_cores), 8)           # >=1 step per core
            if half >= 128:
                tile = min(tile, half)
    if tile >= rows:
        tile = rows            # single full-extent row block (always legal)
    return max(1, tile)


def spatial_softmax(feature, *, force_pallas=False):
    """feature: (N, C, H, W). Returns (N, 2*C) keypoints, matching
    SpatialSoftmax.forward with data_format='NCHW'."""
    N, C, H, W = feature.shape
    rows, HW = N * C, H * W
    itemsize = feature.dtype.itemsize

    if not force_pallas and rows * HW * itemsize < _SMALL_BYTES:
        # Launch + pipeline-priming overhead dominates at tiny sizes; let XLA fuse.
        return _reference(feature)

    vmem_cap, num_cores = _tpu_hw_params()
    tile = _choose_row_tile(rows, HW, itemsize, vmem_cap, num_cores)
    grid = (pl.cdiv(rows, tile),)

    feat2d = feature.reshape(rows, HW)       # native dtype, NO padding copies in HBM
    posw = make_position_rows(H, W)          # (2, HW) f32

    # Explicit, generation-aware VMEM limit (v5e scoped default is only 16 MiB).
    hw_lanes = _round_up(HW, 128)
    resident = (tile * hw_lanes * (2 * itemsize + 2 * 4)    # stream double-buffer + f32 temps
                + 2 * 8 * hw_lanes * 4                      # pos double buffer (sublane-padded)
                + 2 * tile * 128 * 4)                       # out double buffer (lane-padded)
    vmem_limit = int(min(vmem_cap * 3 // 4, max(2 * resident, 32 << 20)))

    cost = pl.CostEstimate(
        flops=int(7 * rows * HW),               # sub + 2 mul + ~4 reduce-adds per element
        transcendentals=int(rows * HW),         # exp
        bytes_accessed=int(rows * HW * itemsize + rows * 2 * 4 + 2 * HW * 4),
    )

    out = pl.pallas_call(
        _spatial_softmax_kernel,
        out_shape=jax.ShapeDtypeStruct((rows, 2), jnp.float32),
        grid=grid,
        in_specs=[
            # Full-extent last dim: legal even when HW % 128 != 0; the compiler
            # masks padding lanes in the reductions, so no wrapper-side pad pass.
            pl.BlockSpec((tile, HW), lambda i: (i, 0)),
            pl.BlockSpec((2, HW), lambda i: (0, 0)),
        ],
        out_specs=pl.BlockSpec((tile, 2), lambda i: (i, 0)),
        compiler_params=pltpu.CompilerParams(
            dimension_semantics=("parallel",),
            vmem_limit_bytes=vmem_limit,
        ),
        cost_estimate=cost,
    )(feat2d, posw)

    return out.reshape(N, C * 2)   # interleave x0,y0,x1,y1,... like torch .view


def _reference(feature):
    """Pure-JAX mirror of the PyTorch forward (NCHW path)."""
    N, C, H, W = feature.shape
    pos_x_np, pos_y_np = np.meshgrid(
        np.linspace(-1.0, 1.0, H), np.linspace(-1.0, 1.0, W)
    )
    pos_x = jnp.asarray(pos_x_np.reshape(H * W), dtype=jnp.float32)
    pos_y = jnp.asarray(pos_y_np.reshape(H * W), dtype=jnp.float32)
    f = feature.reshape(N * C, H * W).astype(jnp.float32) / TEMPERATURE
    p = jax.nn.softmax(f, axis=-1)
    ex = jnp.sum(pos_x[None, :] * p, axis=1, keepdims=True)
    ey = jnp.sum(pos_y[None, :] * p, axis=1, keepdims=True)
    return jnp.concatenate([ex, ey], axis=1).reshape(N, C * 2)


if __name__ == "__main__":
    key = jax.random.PRNGKey(0)
    k1, k2, k3 = jax.random.split(key, 3)

    # Case 1: small shape consistent with the module (batch=2, channels=4, 16x16).
    N, C, H, W = 2, 4, 16, 16
    x = jax.random.normal(k1, (N, C, H, W), dtype=jnp.float32)
    out = jax.block_until_ready(spatial_softmax(x, force_pallas=True))
    ref = _reference(x)
    assert out.shape == (N, 2 * C), out.shape
    np.testing.assert_allclose(np.asarray(out), np.asarray(ref), atol=1e-5, rtol=1e-5)

    # Case 2: bf16 activations + HW not a multiple of 128 (exercises native-dtype
    # streaming and the unpadded full-extent lane block — no wrapper jnp.pad).
    x2 = jax.random.normal(k2, (4, 32, 12, 12), dtype=jnp.float32).astype(jnp.bfloat16)
    out2 = jax.block_until_ready(spatial_softmax(x2, force_pallas=True))
    ref2 = _reference(x2)
    np.testing.assert_allclose(np.asarray(out2), np.asarray(ref2), atol=1e-5, rtol=1e-5)

    # Case 3: rows (N*C = 12) not a multiple of 8 — full-extent row block path.
    x3 = jax.random.normal(k3, (3, 4, 16, 16), dtype=jnp.float32)
    out3 = jax.block_until_ready(spatial_softmax(x3, force_pallas=True))
    ref3 = _reference(x3)
    np.testing.assert_allclose(np.asarray(out3), np.asarray(ref3), atol=1e-5, rtol=1e-5)

    print("KERNEL_OK")
</pallas_src>

<mosaic_0001>
module attributes {stable_mosaic.version = 11 : i64} {
  func.func @_spatial_softmax_kernel(%arg0: i32, %arg1: memref<8x256xf32, #tpu.memory_space<vmem>>, %arg2: memref<2x256xf32, #tpu.memory_space<vmem>>, %arg3: memref<8x2xf32, #tpu.memory_space<vmem>>) attributes {dimension_semantics = [#tpu.dimension_semantics<parallel>], iteration_bounds = array<i64: 1>, scalar_prefetch = 0 : i64, scratch_operands = 0 : i64, tpu.core_type = #tpu.core_type<tc>, window_params = [{transform_indices = @transform_0, window_bounds = array<i64: 8, 256>}, {pipeline_mode = #tpu.pipeline_mode<synchronous>, transform_indices = @transform_1, window_bounds = array<i64: 2, 256>}, {transform_indices = @transform_2, window_bounds = array<i64: 8, 2>}]} {
    %c0 = arith.constant 0 : index
    %c0_0 = arith.constant 0 : index
    %0 = vector.load %arg1[%c0, %c0_0] : memref<8x256xf32, #tpu.memory_space<vmem>>, vector<8x256xf32>
    %cst = arith.constant dense<0xFF800000> : vector<8xf32>
    %1 = vector.multi_reduction <maximumf>, %0, %cst [1] : vector<8x256xf32> to vector<8xf32>
    %2 = vector.shape_cast %1 : vector<8xf32> to vector<8x1xf32>
    %3 = vector.broadcast %2 : vector<8x1xf32> to vector<8x256xf32>
    %4 = arith.subf %0, %3 : vector<8x256xf32>
    %5 = math.exp %4 : vector<8x256xf32>
    %c0_1 = arith.constant 0 : index
    %c0_2 = arith.constant 0 : index
    %6 = vector.load %arg2[%c0_1, %c0_2] : memref<2x256xf32, #tpu.memory_space<vmem>>, vector<2x256xf32>
    %7 = vector.extract_strided_slice %6 {offsets = [0, 0], sizes = [1, 256], strides = [1, 1]} : vector<2x256xf32> to vector<1x256xf32>
    %8 = vector.extract_strided_slice %6 {offsets = [1, 0], sizes = [1, 256], strides = [1, 1]} : vector<2x256xf32> to vector<1x256xf32>
    %cst_3 = arith.constant dense<0.000000e+00> : vector<8xf32>
    %9 = vector.multi_reduction <add>, %5, %cst_3 [1] : vector<8x256xf32> to vector<8xf32>
    %10 = vector.shape_cast %9 : vector<8xf32> to vector<8x1xf32>
    %11 = vector.broadcast %7 : vector<1x256xf32> to vector<8x256xf32>
    %12 = arith.mulf %5, %11 : vector<8x256xf32>
    %cst_4 = arith.constant dense<0.000000e+00> : vector<8xf32>
    %13 = vector.multi_reduction <add>, %12, %cst_4 [1] : vector<8x256xf32> to vector<8xf32>
    %14 = vector.shape_cast %13 : vector<8xf32> to vector<8x1xf32>
    %15 = vector.broadcast %8 : vector<1x256xf32> to vector<8x256xf32>
    %16 = arith.mulf %5, %15 : vector<8x256xf32>
    %cst_5 = arith.constant dense<0.000000e+00> : vector<8xf32>
    %17 = vector.multi_reduction <add>, %16, %cst_5 [1] : vector<8x256xf32> to vector<8xf32>
    %18 = vector.shape_cast %17 : vector<8xf32> to vector<8x1xf32>
    %19 = tpu.reciprocal %10 {approx = true} : vector<8x1xf32> -> vector<8x1xf32>
    %20 = arith.mulf %10, %19 : vector<8x1xf32>
    %cst_6 = arith.constant 2.000000e+00 : f32
    %21 = vector.broadcast %cst_6 : f32 to vector<8x1xf32>
    %22 = arith.subf %21, %20 : vector<8x1xf32>
    %23 = arith.mulf %19, %22 : vector<8x1xf32>
    %24 = arith.mulf %14, %23 : vector<8x1xf32>
    %25 = arith.mulf %18, %23 : vector<8x1xf32>
    %26 = tpu.concatenate %24, %25 in 1 : vector<8x1xf32>, vector<8x1xf32> -> vector<8x2xf32>
    %c0_7 = arith.constant 0 : index
    %c0_8 = arith.constant 0 : index
    %27 = vector.load %arg3[%c0_7, %c0_8] : memref<8x2xf32, #tpu.memory_space<vmem>>, vector<8x2xf32>
    tpu.vector_store %arg3[%c0_7, %c0_8], %26 {strides = array<i32>} : memref<8x2xf32, #tpu.memory_space<vmem>>, vector<8x2xf32>,
    return
  }
  func.func @transform_0(%arg0: i32) -> (i32, i32) {
    %c0_i32 = arith.constant 0 : i32
    %c0_i32_0 = arith.constant 0 : i32
    return %arg0, %c0_i32 : i32, i32
  }
  func.func @transform_1(%arg0: i32) -> (i32, i32) {
    %c0_i32 = arith.constant 0 : i32
    %c0_i32_0 = arith.constant 0 : i32
    %c0_i32_1 = arith.constant 0 : i32
    return %c0_i32, %c0_i32_0 : i32, i32
  }
  func.func @transform_2(%arg0: i32) -> (i32, i32) {
    %c0_i32 = arith.constant 0 : i32
    %c0_i32_0 = arith.constant 0 : i32
    return %arg0, %c0_i32 : i32, i32
  }
}

</mosaic_0001>

<bundles_post_ra>
// kernel: tpu_custom_call.1
= control target key start
LH: loop header
LB: loop body
LE: loop exit
PB: predicated region body
PF: predicated region fallthrough
CT: control target
= control target key end

     0   :  { %7 = vsyncpa [#allocation3], 0  ;;  %s191_s0 = inlined_call_operand.hbm [shape: f32[8,256], index: 0, kind: input, shape index: {}]   ;;  %s192_s1 = inlined_call_operand.hbm [shape: f32[2,256], index: 1, kind: input, shape index: {}]   ;;  %s193_s2 = inlined_call_operand.vmem [shape: f32[8,2], index: 2, kind: output, shape index: {}]  }
   0x1   :  { %8 = vsyncpa [#allocation5], 0  ;;  %s165_s9 = smov [#allocation2]   ;;  %s166_s11 = smov [#allocation4]  }
   0x2   :  { %s15_s10 = sshll.u32 %s165_s9, 4  ;;  %s25_s12 = sshll.u32 %s166_s11, 4  ;;  %s16_s10 = int_to_ptr.vmem [resolvable:$true] %s15_s10  ;;  %s26_s12 = int_to_ptr.vmem [resolvable:$true] %s25_s12 }
   0x3   :  { %s129_s13 = scalar_lea.vmem %s16_s10, 256  ;;  %p134_p1 = scmp.lt.s32.totalorder %s16_s10, %s16_s10 }
   0x4   :  { %p130_p0 = scmp.ne.s32.totalorder %s16_s10, %s129_s13  ;;  %p135_p2 = scmp.lt.s32.totalorder %s129_s13, %s129_s13 }
   0x6   :  { %p136_p3 = por %p135_p2, %p134_p1 }
   0x8   :  { %p137_p4 = pnand %p136_p3, %p130_p0 }
   0xa   :  { %140 = shalt.err (!%p137_p4)
}
   0xb   :  { %18 = dma.hbm_to_vmem [thread:$0]  %s191_s0, 256, %s16_s10, [#allocation3]  }
   0xc   :  { %s149_s16 = scalar_lea.vmem %s26_s12, 64  ;;  %p154_p6 = scmp.lt.s32.totalorder %s26_s12, %s26_s12 }
   0xd   :  { %p150_p5 = scmp.ne.s32.totalorder %s26_s12, %s149_s16  ;;  %p155_p7 = scmp.lt.s32.totalorder %s149_s16, %s149_s16 }
   0xf   :  { %p156_p8 = por %p155_p7, %p154_p6 }
  0x11   :  { %p157_p9 = pnand %p156_p8, %p150_p5 }
  0x13   :  { %160 = shalt.err (!%p157_p9)
}
  0x14   :  { %28 = dma.hbm_to_vmem [thread:$0]  %s192_s1, 64, %s26_s12, [#allocation5]  }
  0x15   :  { %161 = dma.done.wait [#allocation3], 256  }
  0x16   :  { %162 = vsyncadd [#allocation3], 4294967040 }
  0x17   :  { %163 = dma.done.wait [#allocation5], 64  }
  0x18   :  { %164 = vsyncadd [#allocation5], 4294967232  ;;  %v35_v0 = vld [vmem:[#allocation2] sm:$0xff]  ;;  %v36_v1 = vld [vmem:[#allocation2 + $0x8] sm:$0xff]  ;;  %v51_v3 = vlaneseq  ;;  %vm103_vm0 = vcmask 7168   ;;  %vm105_vm1 = vcmask 15360  }
  0x19   :  { %v37_v2 = vmax.f32 %v35_v0, %v36_v1  ;;  %v46_v11 = vld [vmem:[#allocation4] sm:$0xf] }
  0x1a   :  { %v52_v9 = vshrl.u32 %v51_v3, 7 }
  0x1b   :  { %38 = vmax.xlane.f32.xlu0 %v37_v2 }
  0x1c   :  { %v53_v10 = vsub.s32 0, %v52_v9  ;;  %v57_v12 = vsub.s32 2, %v52_v9  ;;  %v76_v13 = vsub.s32 1, %v52_v9  ;;  %v80_v14 = vsub.s32 3, %v52_v9 }
  0x1e   :  { %v54_v15 = vrot.slane %v46_v11, %v53_v10  ;;  %v58_v16 = vrot.slane %v46_v11, %v57_v12  ;;  %v77_v17 = vrot.slane %v46_v11, %v76_v13  ;;  %v81_v18 = vrot.slane %v46_v11, %v80_v14 }
  0x20   :  { %v64_v19 = vrot.slane %v54_v15, %v53_v10  ;;  %v68_v20 = vrot.slane %v58_v16, %v53_v10  ;;  %v87_v22 = vrot.slane %v77_v17, %v76_v13  ;;  %v91_v23 = vrot.slane %v81_v18, %v76_v13 }
  0xa4   :  { %v39_v4 = vpop.xlane.xlu0 %38 }
  0xa5   :  { %v40_v5 = vsub.f32 %v35_v0, %v39_v4  ;;  %v41_v6 = vsub.f32 %v36_v1, %v39_v4 }
  0xa7   :  { %v42_v7 = vmul.f32 1.442695, %v40_v5  ;;  %v44_v8 = vmul.f32 1.442695, %v41_v6 }
  0xa9   :  { %115 = vpow2.f32 %v42_v7 }
  0xaa   :  { %117 = vpow2.f32 %v44_v8 }
  0xb6   :  { %v116_v21 = vpop.eup %115 }
  0xb7   :  { %v118_v24 = vpop.eup %117  ;;  %v69_v25 = vmul.f32 %v116_v21, %v64_v19  ;;  %v92_v29 = vmul.f32 %v116_v21, %v87_v22 }
  0xb8   :  { %v47_v26 = vadd.f32 %v118_v24, %v116_v21  ;;  %v70_v27 = vmul.f32 %v118_v24, %v68_v20  ;;  %v93_v30 = vmul.f32 %v118_v24, %v91_v23 }
  0xba   :  { %48 = vadd.xlane.f32.xlu0 %v47_v26  ;;  %v71_v28 = vadd.f32 %v70_v27, %v69_v25  ;;  %v94_v31 = vadd.f32 %v93_v30, %v92_v29 }
  0xbc   :  { %72 = vadd.xlane.f32.xlu1 %v71_v28 }
  0xc0   :  { %95 = vadd.xlane.f32.xlu1 %v94_v31 }
 0x143   :  { %v49_v32 = vpop.xlane.xlu0 %48 }
 0x144   :  { %119 = vrcp.f32 %v49_v32 }
 0x145   :  { %v73_v34 = vpop.xlane.xlu1 %72 }
 0x149   :  { %v96_v38 = vpop.xlane.xlu1 %95 }
 0x151   :  { %v120_v33 = vpop.eup %119 }
 0x152   :  { %v98_v35 = vmul.f32 %v120_v33, %v49_v32 }
 0x154   :  { %v99_v36 = vsub.f32 2.0, %v98_v35 }
 0x156   :  { %v100_v37 = vmul.f32 %v120_v33, %v99_v36 }
 0x158   :  { %v101_v39 = vmul.f32 %v100_v37, %v73_v34  ;;  %v102_v40 = vmul.f32 %v100_v37, %v96_v38 }
 0x15a   :  { %v104_v41 = vsel %vm103_vm0, %v101_v39, %v102_v40 }
 0x15b   :  { %106 = vst.msk [vmem:[%s193_s2] sm:$0xff] %vm105_vm1, %v104_v41 }
 0x15c   :  { %111 = vsyncpa [#allocation3], 1 }
 0x15d   :  { %112 = vsyncpa [#allocation5], 1 }

</bundles_post_ra>
